<compile_context>
chip_gen: v7x
topology: tpu7x:2x2x1
jax: 0.10.0
libtpu: 0.0.40
codegen_flags: <defaults>
</compile_context>

<pallas_src>
import jax
import jax.numpy as jnp
from jax.experimental import pallas as pl
from jax.experimental.pallas import tpu as pltpu


def _vmem_capacity_bytes():
    """Physical VMEM per core; conservative fallback if the query fails."""
    try:
        info = pltpu.get_tpu_info()
        for name in ("vmem_capacity_bytes", "vmem_size_bytes", "vmem_bytes"):
            cap = getattr(info, name, None)
            if cap:
                return int(cap)
    except Exception:
        pass
    return 64 << 20  # v7x per-TC physical VMEM (most restrictive generation)


def _make_kernel(Nb, C, n_full, tail, inv_hw):
    CHUNK = 128

    def kernel(x_ref, w1t_ref, w2_ref, o_ref):
        # x_ref : (Nb, C, HW) native dtype
        # w1t_ref: (C, Cr) f32   (fc1 weight, transposed)
        # w2_ref : (C, Cr) f32   (fc2 weight)
        # o_ref : (Nb, C, HW)
        f32 = jnp.float32

        # ---- fused mean/max pooling: one sweep, lane-wide accumulators ----
        if n_full > 0:
            def body(i, carry):
                s_acc, m_acc = carry
                start = pl.multiple_of(i * CHUNK, CHUNK)
                blk = x_ref[:, :, pl.ds(start, CHUNK)].astype(f32)  # (Nb,C,128)
                return s_acc + blk, jnp.maximum(m_acc, blk)

            init = (jnp.zeros((Nb, C, CHUNK), f32),
                    jnp.full((Nb, C, CHUNK), -jnp.inf, f32))
            s_acc, m_acc = jax.lax.fori_loop(
                0, n_full, body, init,
                unroll=True if n_full <= 16 else 8)
            # single cross-lane reduction after the loop
            s = jnp.sum(s_acc, axis=-1, keepdims=True)          # (Nb, C, 1)
            m = jnp.max(m_acc, axis=-1, keepdims=True)          # (Nb, C, 1)
        else:
            s = jnp.zeros((Nb, C, 1), f32)
            m = jnp.full((Nb, C, 1), -jnp.inf, f32)

        # statically-sized ragged tail (only chunk that isn't 128 lanes wide)
        if tail > 0:
            tblk = x_ref[:, :, pl.ds(n_full * CHUNK, tail)].astype(f32)
            s = s + jnp.sum(tblk, axis=-1, keepdims=True)
            m = jnp.maximum(m, jnp.max(tblk, axis=-1, keepdims=True))

        avg = s * inv_hw                                         # (Nb, C, 1)

        w1t = w1t_ref[...]                                       # (C, Cr)
        w2 = w2_ref[...]                                         # (C, Cr)

        # ---- tiny shared MLP + gate apply (per batch element, Nb static) ---
        for n in range(Nb):
            avg_n = avg[n]                                       # (C, 1)
            max_n = m[n]                                         # (C, 1)
            # fc1 + relu for both branches (sublane reduce); fc2 is linear so
            # fc2(relu(a)) + fc2(relu(b)) == fc2(relu(a) + relu(b)).
            h = (jnp.maximum(jnp.sum(w1t * avg_n, axis=0, keepdims=True), 0.0)
                 + jnp.maximum(jnp.sum(w1t * max_n, axis=0, keepdims=True),
                               0.0))                             # (1, Cr)
            logit = jnp.sum(w2 * h, axis=1, keepdims=True)       # (C, 1)
            gate = jax.nn.sigmoid(logit)                         # (C, 1) f32

            # single fused multiply-store; x stays in its native dtype
            x_n = x_ref[n]                                       # (C, HW)
            o_ref[n] = (x_n * gate.astype(x_n.dtype)).astype(o_ref.dtype)

    return kernel


def channel_attention(x_nchw, w1, w2):
    """x_nchw: (N, C, H, W); w1: (C//r, C); w2: (C, C//r)."""
    N, C, H, W = x_nchw.shape
    Cr = w1.shape[0]
    HW = H * W

    # Free, contiguous reshape only — no pad, no post-slice.
    x_flat = x_nchw.reshape(N, C, HW)
    w1t = jnp.transpose(w1).astype(jnp.float32)    # (C, Cr)
    w2f = w2.astype(jnp.float32)                   # (C, Cr)

    elem = jnp.dtype(x_nchw.dtype).itemsize
    per_n_bytes = C * HW * elem

    # Batch several N per grid step for small feature maps (amortize per-step
    # overhead, larger lane-dense DMAs).  Nb must divide N; block target ~4MiB.
    target_block = 4 << 20
    Nb = 1
    for nb in range(1, min(N, 8) + 1):
        if N % nb == 0 and nb * per_n_bytes <= target_block:
            Nb = nb

    n_full, tail = divmod(HW, 128)

    kernel = _make_kernel(Nb=Nb, C=C, n_full=n_full, tail=tail,
                          inv_hw=1.0 / float(HW))

    # VMEM budget: double-buffered input + output blocks, double-buffered
    # weights, headroom; capped at 85% of this generation's physical VMEM.
    block_bytes = Nb * per_n_bytes
    vmem_cap = _vmem_capacity_bytes()
    vmem_limit = int(min(max(4 * block_bytes + 4 * 2 * C * Cr * 4 + (4 << 20),
                             16 << 20),
                         int(vmem_cap * 0.85)))

    out_flat = pl.pallas_call(
        kernel,
        out_shape=jax.ShapeDtypeStruct((N, C, HW), x_nchw.dtype),
        grid_spec=pltpu.PrefetchScalarGridSpec(
            num_scalar_prefetch=0,
            grid=(N // Nb,),
            in_specs=[
                # last two block dims equal the full array dims -> exempt from
                # the (8,128) divisibility rule even for ragged HW.
                pl.BlockSpec((Nb, C, HW), lambda b: (b, 0, 0)),
                pl.BlockSpec((C, Cr), lambda b: (0, 0)),
                pl.BlockSpec((C, Cr), lambda b: (0, 0)),
            ],
            out_specs=pl.BlockSpec((Nb, C, HW), lambda b: (b, 0, 0)),
        ),
        compiler_params=pltpu.CompilerParams(
            dimension_semantics=("parallel",),
            vmem_limit_bytes=vmem_limit,
        ),
    )(x_flat, w1t, w2f)

    return out_flat.reshape(N, C, H, W)


def channel_attention_ref(x, w1, w2):
    # Pure-JAX reference matching the PyTorch forward.
    avg = jnp.mean(x, axis=(2, 3), keepdims=True)          # (N, C, 1, 1)
    mx = jnp.max(x, axis=(2, 3), keepdims=True)            # (N, C, 1, 1)

    def fc(v):  # v: (N, C, 1, 1)
        h = jnp.maximum(jnp.einsum("rc,ncij->nrij", w1, v), 0.0)
        return jnp.einsum("cr,nrij->ncij", w2, h)

    gate = jax.nn.sigmoid(fc(avg) + fc(mx))                # (N, C, 1, 1)
    return gate * x


if __name__ == "__main__":
    # Module config: in_planes=8, ratio=4 -> hidden channels = 2
    C = 8
    ratio = 4
    Cr = C // ratio

    key = jax.random.PRNGKey(0)
    kx, k1, k2, kx2 = jax.random.split(key, 4)

    # Conv2d(C, C//r, 1, bias=False) weight (out,in,1,1) squeezed -> (Cr, C)
    w1 = 0.3 * jax.random.normal(k1, (Cr, C), dtype=jnp.float32)
    # Conv2d(C//r, C, 1, bias=False) weight squeezed -> (C, Cr)
    w2 = 0.3 * jax.random.normal(k2, (C, Cr), dtype=jnp.float32)

    ok = True

    # Case 1: 128-aligned spatial size (HW = 256).
    N, H, W = 2, 16, 16
    x = jax.random.normal(kx, (N, C, H, W), dtype=jnp.float32)
    y = jax.block_until_ready(channel_attention(x, w1, w2))
    y_ref = channel_attention_ref(x, w1, w2)
    ok &= (y.shape == (N, C, H, W))
    ok &= bool(jnp.allclose(y, y_ref, atol=1e-5, rtol=1e-5))

    # Case 2: ragged spatial size (HW = 196) — exercises the in-kernel tail
    # path that replaced the wrapper pad/slice passes.
    N2, H2, W2 = 2, 14, 14
    x2 = jax.random.normal(kx2, (N2, C, H2, W2), dtype=jnp.float32)
    y2 = jax.block_until_ready(channel_attention(x2, w1, w2))
    y2_ref = channel_attention_ref(x2, w1, w2)
    ok &= (y2.shape == (N2, C, H2, W2))
    ok &= bool(jnp.allclose(y2, y2_ref, atol=1e-5, rtol=1e-5))

    assert ok, "mismatch vs reference"
    print("KERNEL_OK")
</pallas_src>

<mosaic_0001>
module attributes {stable_mosaic.version = 11 : i64} {
  func.func @kernel(%arg0: i32, %arg1: memref<2x8x256xf32, #tpu.memory_space<vmem>>, %arg2: memref<8x2xf32, #tpu.memory_space<vmem>>, %arg3: memref<8x2xf32, #tpu.memory_space<vmem>>, %arg4: memref<2x8x256xf32, #tpu.memory_space<vmem>>) attributes {dimension_semantics = [#tpu.dimension_semantics<parallel>], iteration_bounds = array<i64: 1>, scalar_prefetch = 0 : i64, scratch_operands = 0 : i64, tpu.core_type = #tpu.core_type<tc>, window_params = [{transform_indices = @transform_0, window_bounds = array<i64: 2, 8, 256>}, {pipeline_mode = #tpu.pipeline_mode<synchronous>, transform_indices = @transform_1, window_bounds = array<i64: 8, 2>}, {pipeline_mode = #tpu.pipeline_mode<synchronous>, transform_indices = @transform_2, window_bounds = array<i64: 8, 2>}, {transform_indices = @transform_3, window_bounds = array<i64: 2, 8, 256>}]} {
    %cst = arith.constant 0.000000e+00 : f32
    %0 = vector.broadcast %cst : f32 to vector<2x8x128xf32>
    %cst_0 = arith.constant 0xFF800000 : f32
    %1 = vector.broadcast %cst_0 : f32 to vector<2x8x128xf32>
    %c0_i32 = arith.constant 0 : i32
    %c128_i32 = arith.constant 128 : i32
    %2 = arith.muli %c0_i32, %c128_i32 : i32
    %3 = tpu.assume_multiple %2, 128 : i32
    %c0 = arith.constant 0 : index
    %c0_1 = arith.constant 0 : index
    %4 = arith.index_cast %3 : i32 to index
    %5 = vector.load %arg1[%c0, %c0_1, %4] : memref<2x8x256xf32, #tpu.memory_space<vmem>>, vector<2x8x128xf32>
    %6 = arith.addf %0, %5 : vector<2x8x128xf32>
    %7 = arith.maximumf %1, %5 : vector<2x8x128xf32>
    %c1_i32 = arith.constant 1 : i32
    %c128_i32_2 = arith.constant 128 : i32
    %8 = arith.muli %c1_i32, %c128_i32_2 : i32
    %9 = tpu.assume_multiple %8, 128 : i32
    %c0_3 = arith.constant 0 : index
    %c0_4 = arith.constant 0 : index
    %10 = arith.index_cast %9 : i32 to index
    %11 = vector.load %arg1[%c0_3, %c0_4, %10] : memref<2x8x256xf32, #tpu.memory_space<vmem>>, vector<2x8x128xf32>
    %12 = arith.addf %6, %11 : vector<2x8x128xf32>
    %13 = arith.maximumf %7, %11 : vector<2x8x128xf32>
    %c2_i32 = arith.constant 2 : i32
    %cst_5 = arith.constant dense<0.000000e+00> : vector<2x8xf32>
    %14 = vector.multi_reduction <add>, %12, %cst_5 [2] : vector<2x8x128xf32> to vector<2x8xf32>
    %15 = vector.shape_cast %14 : vector<2x8xf32> to vector<2x8x1xf32>
    %cst_6 = arith.constant dense<0xFF800000> : vector<2x8xf32>
    %16 = vector.multi_reduction <maximumf>, %13, %cst_6 [2] : vector<2x8x128xf32> to vector<2x8xf32>
    %17 = vector.shape_cast %16 : vector<2x8xf32> to vector<2x8x1xf32>
    %cst_7 = arith.constant 3.906250e-03 : f32
    %18 = vector.broadcast %cst_7 : f32 to vector<2x8x1xf32>
    %19 = arith.mulf %15, %18 : vector<2x8x1xf32>
    %c0_8 = arith.constant 0 : index
    %c0_9 = arith.constant 0 : index
    %20 = vector.load %arg2[%c0_8, %c0_9] : memref<8x2xf32, #tpu.memory_space<vmem>>, vector<8x2xf32>
    %c0_10 = arith.constant 0 : index
    %c0_11 = arith.constant 0 : index
    %21 = vector.load %arg3[%c0_10, %c0_11] : memref<8x2xf32, #tpu.memory_space<vmem>>, vector<8x2xf32>
    %22 = vector.extract_strided_slice %19 {offsets = [0, 0, 0], sizes = [1, 8, 1], strides = [1, 1, 1]} : vector<2x8x1xf32> to vector<1x8x1xf32>
    %23 = vector.shape_cast %22 : vector<1x8x1xf32> to vector<8x1xf32>
    %24 = vector.extract_strided_slice %17 {offsets = [0, 0, 0], sizes = [1, 8, 1], strides = [1, 1, 1]} : vector<2x8x1xf32> to vector<1x8x1xf32>
    %25 = vector.shape_cast %24 : vector<1x8x1xf32> to vector<8x1xf32>
    %26 = vector.broadcast %23 : vector<8x1xf32> to vector<8x2xf32>
    %27 = arith.mulf %20, %26 : vector<8x2xf32>
    %cst_12 = arith.constant dense<0.000000e+00> : vector<2xf32>
    %28 = vector.multi_reduction <add>, %27, %cst_12 [0] : vector<8x2xf32> to vector<2xf32>
    %29 = vector.shape_cast %28 : vector<2xf32> to vector<1x2xf32>
    %cst_13 = arith.constant 0.000000e+00 : f32
    %30 = vector.broadcast %cst_13 : f32 to vector<1x2xf32>
    %31 = arith.maximumf %29, %30 : vector<1x2xf32>
    %32 = vector.broadcast %25 : vector<8x1xf32> to vector<8x2xf32>
    %33 = arith.mulf %20, %32 : vector<8x2xf32>
    %cst_14 = arith.constant dense<0.000000e+00> : vector<2xf32>
    %34 = vector.multi_reduction <add>, %33, %cst_14 [0] : vector<8x2xf32> to vector<2xf32>
    %35 = vector.shape_cast %34 : vector<2xf32> to vector<1x2xf32>
    %cst_15 = arith.constant 0.000000e+00 : f32
    %36 = vector.broadcast %cst_15 : f32 to vector<1x2xf32>
    %37 = arith.maximumf %35, %36 : vector<1x2xf32>
    %38 = arith.addf %31, %37 : vector<1x2xf32>
    %39 = vector.broadcast %38 : vector<1x2xf32> to vector<8x2xf32>
    %40 = arith.mulf %21, %39 : vector<8x2xf32>
    %cst_16 = arith.constant dense<0.000000e+00> : vector<8xf32>
    %41 = vector.multi_reduction <add>, %40, %cst_16 [1] : vector<8x2xf32> to vector<8xf32>
    %42 = vector.shape_cast %41 : vector<8xf32> to vector<8x1xf32>
    %43 = arith.negf %42 : vector<8x1xf32>
    %44 = math.exp %43 : vector<8x1xf32>
    %cst_17 = arith.constant 1.000000e+00 : f32
    %45 = vector.broadcast %cst_17 : f32 to vector<8x1xf32>
    %46 = arith.addf %45, %44 : vector<8x1xf32>
    %47 = arith.divf %45, %46 : vector<8x1xf32>
    %c0_18 = arith.constant 0 : index
    %c0_19 = arith.constant 0 : index
    %c0_20 = arith.constant 0 : index
    %48 = vector.load %arg1[%c0_18, %c0_19, %c0_20] : memref<2x8x256xf32, #tpu.memory_space<vmem>>, vector<1x8x256xf32>
    %49 = vector.shape_cast %48 : vector<1x8x256xf32> to vector<8x256xf32>
    %50 = vector.broadcast %47 : vector<8x1xf32> to vector<8x256xf32>
    %51 = arith.mulf %49, %50 : vector<8x256xf32>
    %c0_21 = arith.constant 0 : index
    %c0_22 = arith.constant 0 : index
    %c0_23 = arith.constant 0 : index
    %52 = vector.load %arg4[%c0_21, %c0_22, %c0_23] : memref<2x8x256xf32, #tpu.memory_space<vmem>>, vector<1x8x256xf32>
    %53 = vector.shape_cast %52 : vector<1x8x256xf32> to vector<8x256xf32>
    %54 = vector.shape_cast %51 : vector<8x256xf32> to vector<1x8x256xf32>
    tpu.vector_store %arg4[%c0_21, %c0_22, %c0_23], %54 {strides = array<i32>} : memref<2x8x256xf32, #tpu.memory_space<vmem>>, vector<1x8x256xf32>,
    %55 = vector.extract_strided_slice %19 {offsets = [1, 0, 0], sizes = [1, 8, 1], strides = [1, 1, 1]} : vector<2x8x1xf32> to vector<1x8x1xf32>
    %56 = vector.shape_cast %55 : vector<1x8x1xf32> to vector<8x1xf32>
    %57 = vector.extract_strided_slice %17 {offsets = [1, 0, 0], sizes = [1, 8, 1], strides = [1, 1, 1]} : vector<2x8x1xf32> to vector<1x8x1xf32>
    %58 = vector.shape_cast %57 : vector<1x8x1xf32> to vector<8x1xf32>
    %59 = vector.broadcast %56 : vector<8x1xf32> to vector<8x2xf32>
    %60 = arith.mulf %20, %59 : vector<8x2xf32>
    %cst_24 = arith.constant dense<0.000000e+00> : vector<2xf32>
    %61 = vector.multi_reduction <add>, %60, %cst_24 [0] : vector<8x2xf32> to vector<2xf32>
    %62 = vector.shape_cast %61 : vector<2xf32> to vector<1x2xf32>
    %cst_25 = arith.constant 0.000000e+00 : f32
    %63 = vector.broadcast %cst_25 : f32 to vector<1x2xf32>
    %64 = arith.maximumf %62, %63 : vector<1x2xf32>
    %65 = vector.broadcast %58 : vector<8x1xf32> to vector<8x2xf32>
    %66 = arith.mulf %20, %65 : vector<8x2xf32>
    %cst_26 = arith.constant dense<0.000000e+00> : vector<2xf32>
    %67 = vector.multi_reduction <add>, %66, %cst_26 [0] : vector<8x2xf32> to vector<2xf32>
    %68 = vector.shape_cast %67 : vector<2xf32> to vector<1x2xf32>
    %cst_27 = arith.constant 0.000000e+00 : f32
    %69 = vector.broadcast %cst_27 : f32 to vector<1x2xf32>
    %70 = arith.maximumf %68, %69 : vector<1x2xf32>
    %71 = arith.addf %64, %70 : vector<1x2xf32>
    %72 = vector.broadcast %71 : vector<1x2xf32> to vector<8x2xf32>
    %73 = arith.mulf %21, %72 : vector<8x2xf32>
    %cst_28 = arith.constant dense<0.000000e+00> : vector<8xf32>
    %74 = vector.multi_reduction <add>, %73, %cst_28 [1] : vector<8x2xf32> to vector<8xf32>
    %75 = vector.shape_cast %74 : vector<8xf32> to vector<8x1xf32>
    %76 = arith.negf %75 : vector<8x1xf32>
    %77 = math.exp %76 : vector<8x1xf32>
    %cst_29 = arith.constant 1.000000e+00 : f32
    %78 = vector.broadcast %cst_29 : f32 to vector<8x1xf32>
    %79 = arith.addf %78, %77 : vector<8x1xf32>
    %80 = arith.divf %78, %79 : vector<8x1xf32>
    %c1 = arith.constant 1 : index
    %c0_30 = arith.constant 0 : index
    %c0_31 = arith.constant 0 : index
    %81 = vector.load %arg1[%c1, %c0_30, %c0_31] : memref<2x8x256xf32, #tpu.memory_space<vmem>>, vector<1x8x256xf32>
    %82 = vector.shape_cast %81 : vector<1x8x256xf32> to vector<8x256xf32>
    %83 = vector.broadcast %80 : vector<8x1xf32> to vector<8x256xf32>
    %84 = arith.mulf %82, %83 : vector<8x256xf32>
    %c1_32 = arith.constant 1 : index
    %c0_33 = arith.constant 0 : index
    %c0_34 = arith.constant 0 : index
    %85 = vector.load %arg4[%c1_32, %c0_33, %c0_34] : memref<2x8x256xf32, #tpu.memory_space<vmem>>, vector<1x8x256xf32>
    %86 = vector.shape_cast %85 : vector<1x8x256xf32> to vector<8x256xf32>
    %87 = vector.shape_cast %84 : vector<8x256xf32> to vector<1x8x256xf32>
    tpu.vector_store %arg4[%c1_32, %c0_33, %c0_34], %87 {strides = array<i32>} : memref<2x8x256xf32, #tpu.memory_space<vmem>>, vector<1x8x256xf32>,
    return
  }
  func.func @transform_0(%arg0: i32) -> (i32, i32, i32) {
    %c0_i32 = arith.constant 0 : i32
    %c0_i32_0 = arith.constant 0 : i32
    %c0_i32_1 = arith.constant 0 : i32
    return %arg0, %c0_i32, %c0_i32_0 : i32, i32, i32
  }
  func.func @transform_1(%arg0: i32) -> (i32, i32) {
    %c0_i32 = arith.constant 0 : i32
    %c0_i32_0 = arith.constant 0 : i32
    %c0_i32_1 = arith.constant 0 : i32
    return %c0_i32, %c0_i32_0 : i32, i32
  }
  func.func @transform_2(%arg0: i32) -> (i32, i32) {
    %c0_i32 = arith.constant 0 : i32
    %c0_i32_0 = arith.constant 0 : i32
    %c0_i32_1 = arith.constant 0 : i32
    return %c0_i32, %c0_i32_0 : i32, i32
  }
  func.func @transform_3(%arg0: i32) -> (i32, i32, i32) {
    %c0_i32 = arith.constant 0 : i32
    %c0_i32_0 = arith.constant 0 : i32
    %c0_i32_1 = arith.constant 0 : i32
    return %arg0, %c0_i32, %c0_i32_0 : i32, i32, i32
  }
}

</mosaic_0001>

<bundles_post_ra>
// kernel: tpu_custom_call.1
= control target key start
LH: loop header
LB: loop body
LE: loop exit
PB: predicated region body
PF: predicated region fallthrough
CT: control target
= control target key end

     0   :  { %8 = vsyncpa [#allocation3], 0  ;;  %s290_s0 = inlined_call_operand.hbm [shape: f32[2,8,256], index: 0, kind: input, shape index: {}]   ;;  %s291_s1 = inlined_call_operand.vmem [shape: f32[8,2], index: 1, kind: input, shape index: {}]   ;;  %s292_s2 = inlined_call_operand.vmem [shape: f32[8,2], index: 2, kind: input, shape index: {}]   ;;  %s293_s3 = inlined_call_operand.hbm [shape: f32[2,8,256], index: 3, kind: output, shape index: {}]  }
   0x1   :  { %9 = vsyncpa [#allocation4], 0  ;;  %s204_s12 = smov [#allocation2]   ;;  %s156_s16 = scalar_lea.hbm %s290_s0, 512 }
   0x2   :  { %s15_s13 = sshll.u32 %s204_s12, 4  ;;  %p157_p0 = scmp.ne.s32.totalorder %s290_s0, %s156_s16  ;;  %s16_s13 = int_to_ptr.vmem [resolvable:$true] %s15_s13 }
   0x3   :  { %p160_p1 = scmp.lt.u32.totalorder %s156_s16, %s290_s0 }
   0x5   :  { %p162_p2 = pnand %p160_p1, %p157_p0 }
   0x7   :  { %165 = shalt.err (!%p162_p2)
}
   0x8   :  { %s166_s21 = scalar_lea.vmem %s16_s13, 512  ;;  %p171_p4 = scmp.lt.s32.totalorder %s16_s13, %s16_s13 }
   0x9   :  { %p167_p3 = scmp.ne.s32.totalorder %s16_s13, %s166_s21  ;;  %p172_p5 = scmp.lt.s32.totalorder %s166_s21, %s166_s21 }
   0xb   :  { %p173_p6 = por %p172_p5, %p171_p4 }
   0xd   :  { %p174_p7 = pnand %p173_p6, %p167_p3 }
   0xf   :  { %177 = shalt.err (!%p174_p7)
}
  0x10   :  { %s205_s22 = smov 256   ;;  %s206_s23 = smov 16  }
  0x11   :  { %21 = dma.hbm_to_vmem [thread:$0]  %s290_s0, 512, %s16_s13, [#allocation3], %s205_s22, %s205_s22, %s206_s23  }
  0x12   :  { %200 = dma.done.wait [#allocation3], 512  }
  0x13   :  { %201 = vsyncadd [#allocation3], 4294966784  ;;  %v243_v0 = vld [vmem:[#allocation2] sm:$0xff]  ;;  %v245_v1 = vld [vmem:[#allocation2 + $0x8] sm:$0xff]  ;;  %vm53_vm0 = vcmask 15360  }
  0x14   :  { %v247_v2 = vld [vmem:[#allocation2 + $0x10] sm:$0xff]  ;;  %v38_v3 = vmax.f32 %v243_v0, %v245_v1  ;;  %v36_v4 = vadd.f32 %v245_v1, %v243_v0  ;;  %v253_v5 = vld [vmem:[#allocation2 + $0x18] sm:$0xff]  ;;  %v50_v8 = vld [vmem:[%s291_s1] sm:$0xff] }
  0x15   :  { %v39_v6 = vmax.f32 %v247_v2, %v253_v5  ;;  %v37_v7 = vadd.f32 %v253_v5, %v247_v2  ;;  %v51_v48 = vld [vmem:[%s292_s2] sm:$0xff]  ;;  %s207_s2 = smov [#allocation5]  }
  0x16   :  { %44 = vmax.xlane.f32.xlu1 %v38_v3  ;;  %40 = vadd.xlane.f32.xlu0 %v36_v4  ;;  %s130_s28 = sshll.u32 %s207_s2, 4  ;;  %s131_s28 = int_to_ptr.vmem [resolvable:$true] %s130_s28 }
  0x17   :  { %s178_s29 = scalar_lea.vmem %s131_s28, 512  ;;  %p183_p9 = scmp.lt.s32.totalorder %s131_s28, %s131_s28 }
  0x18   :  { %p179_p8 = scmp.ne.s32.totalorder %s131_s28, %s178_s29  ;;  %p184_p10 = scmp.lt.s32.totalorder %s178_s29, %s178_s29 }
  0x1a   :  { %46 = vmax.xlane.f32.xlu1 %v39_v6  ;;  %42 = vadd.xlane.f32.xlu0 %v37_v7  ;;  %p185_p11 = por %p184_p10, %p183_p9 }
  0x1c   :  { %p186_p12 = pnand %p185_p11, %p179_p8 }
  0xa3   :  { %v45_v9 = vpop.xlane.xlu1 %44  ;;  %v41_v10 = vpop.xlane.xlu0 %40 }
  0xa4   :  { %v62_v11 = vmul.f32 %v50_v8, %v45_v9  ;;  %v48_v12 = vmul.f32 0.00390625, %v41_v10 }
  0xa6   :  { %v63_v13 = vsel %vm53_vm0, %v62_v11, 0.0  ;;  %v52_v14 = vmul.f32 %v50_v8, %v48_v12 }
  0xa7   :  { %v64_v15 = vrot.slane %v63_v13, 4  ;;  %v47_v16 = vpop.xlane.xlu1 %46  ;;  %v43_v17 = vpop.xlane.xlu0 %42 }
  0xa8   :  { %v54_v18 = vsel %vm53_vm0, %v52_v14, 0.0  ;;  %v97_v19 = vmul.f32 %v50_v8, %v47_v16  ;;  %v49_v20 = vmul.f32 0.00390625, %v43_v17 }
  0xa9   :  { %v65_v21 = vadd.f32 %v64_v15, %v63_v13  ;;  %v55_v22 = vrot.slane %v54_v18, 4 }
  0xaa   :  { %v98_v23 = vsel %vm53_vm0, %v97_v19, 0.0  ;;  %v88_v24 = vmul.f32 %v50_v8, %v49_v20 }
  0xab   :  { %v66_v25 = vrot.slane %v65_v21, 2  ;;  %v56_v26 = vadd.f32 %v55_v22, %v54_v18  ;;  %v99_v27 = vrot.slane %v98_v23, 4 }
  0xac   :  { %v89_v28 = vsel %vm53_vm0, %v88_v24, 0.0 }
  0xad   :  { %v67_v29 = vadd.f32 %v66_v25, %v65_v21  ;;  %v57_v30 = vrot.slane %v56_v26, 2  ;;  %v100_v31 = vadd.f32 %v99_v27, %v98_v23  ;;  %v90_v32 = vrot.slane %v89_v28, 4 }
  0xaf   :  { %v68_v33 = vrot.slane %v67_v29, 1  ;;  %v58_v34 = vadd.f32 %v57_v30, %v56_v26  ;;  %v101_v35 = vrot.slane %v100_v31, 2  ;;  %v91_v36 = vadd.f32 %v90_v32, %v89_v28 }
  0xb1   :  { %v102_v37 = vadd.f32 %v101_v35, %v100_v31  ;;  %v92_v38 = vrot.slane %v91_v36, 2  ;;  %v59_v39 = vrot.slane %v58_v34, 1  ;;  %v69_v40 = vadd.f32 %v68_v33, %v67_v29 }
  0xb3   :  { %v103_v41 = vrot.slane %v102_v37, 1  ;;  %v93_v42 = vadd.f32 %v92_v38, %v91_v36  ;;  %v60_v43 = vadd.f32 %v59_v39, %v58_v34  ;;  %v70_v45 = vmax.f32 %v69_v40, 0.0 }
  0xb5   :  { %v61_v44 = vmax.f32 %v60_v43, 0.0  ;;  %v94_v46 = vrot.slane %v93_v42, 1  ;;  %v104_v47 = vadd.f32 %v103_v41, %v102_v37 }
  0xb7   :  { %v71_v49 = vadd.f32 %v70_v45, %v61_v44  ;;  %v95_v50 = vadd.f32 %v94_v46, %v93_v42  ;;  %v105_v53 = vmax.f32 %v104_v47, 0.0 }
  0xb9   :  { %v72_v51 = vmul.f32 %v71_v49, %v51_v48  ;;  %v96_v52 = vmax.f32 %v95_v50, 0.0 }
  0xbb   :  { %v73_v54 = vsel %vm53_vm0, %v72_v51, 0.0  ;;  %v106_v55 = vadd.f32 %v105_v53, %v96_v52 }
  0xbc   :  { %74 = vadd.xlane.f32.xlu0 %v73_v54 }
  0xbd   :  { %v107_v56 = vmul.f32 %v106_v55, %v51_v48 }
  0xbf   :  { %v108_v57 = vsel %vm53_vm0, %v107_v56, 0.0 }
  0xc0   :  { %109 = vadd.xlane.f32.xlu1 %v108_v57 }
 0x149   :  { %v75_v58 = vpop.xlane.xlu0 %74 }
 0x14a   :  { %v142_v59 = vmul.f32 -1.442695, %v75_v58 }
 0x14c   :  { %148 = vpow2.f32 %v142_v59 }
 0x14d   :  { %v110_v60 = vpop.xlane.xlu1 %109 }
 0x14e   :  { %v143_v61 = vmul.f32 -1.442695, %v110_v60 }
 0x150   :  { %150 = vpow2.f32 %v143_v61 }
 0x156   :  { %v149_v62 = vpop.eup %148 }
 0x157   :  { %v79_v63 = vadd.f32 1.0, %v149_v62 }
 0x159   :  { %152 = vrcp.f32 %v79_v63 }
 0x15a   :  { %v151_v3 = vpop.eup %150 }
 0x15b   :  { %v114_v4 = vadd.f32 1.0, %v151_v3 }
 0x15d   :  { %154 = vrcp.f32 %v114_v4 }
 0x163   :  { %v153_v6 = vpop.eup %152 }
 0x164   :  { %v84_v7 = vmul.f32 %v153_v6, %v243_v0  ;;  %v85_v8 = vmul.f32 %v153_v6, %v245_v1 }
 0x166   :  { %86 = vst [vmem:[#allocation5] sm:$0xff] %v84_v7  ;;  %87 = vst [vmem:[#allocation5 + $0x8] sm:$0xff] %v85_v8 }
 0x167   :  { %v155_v9 = vpop.eup %154 }
 0x168   :  { %v120_v10 = vmul.f32 %v155_v9, %v247_v2  ;;  %v121_v11 = vmul.f32 %v155_v9, %v253_v5 }
 0x16a   :  { %123 = vst [vmem:[#allocation5 + $0x10] sm:$0xff] %v120_v10  ;;  %124 = vst [vmem:[#allocation5 + $0x18] sm:$0xff] %v121_v11 }
 0x16b   :  { %189 = shalt.err (!%p186_p12)
}
 0x16c   :  { %s190_s5 = scalar_lea.hbm %s293_s3, 512 }
 0x16d   :  { %p191_p13 = scmp.ne.s32.totalorder %s293_s3, %s190_s5  ;;  %p194_p0 = scmp.lt.u32.totalorder %s190_s5, %s293_s3 }
 0x16f   :  { %p196_p1 = pnand %p194_p0, %p191_p13 }
 0x171   :  { %199 = shalt.err (!%p196_p1)
}
 0x172   :  { %136 = dma.vmem_to_hbm [thread:$0]  %s131_s28, 512, %s293_s3, [#allocation4], %s205_s22, %s205_s22, %s206_s23  }
 0x173   :  { %202 = dma.done.wait [#allocation4], 512  }
 0x174   :  { %203 = vsyncadd [#allocation4], 4294966784 }
 0x175   :  { %140 = vsyncpa [#allocation3], 1 }
 0x176   :  { %141 = vsyncpa [#allocation4], 1 }

</bundles_post_ra>
